<compile_context>
chip_gen: v5e
topology: v5e:2x2
jax: 0.10.0
libtpu: 0.0.40
codegen_flags: <defaults>
</compile_context>

<pallas_src>
import functools

import numpy as np
import jax
import jax.numpy as jnp
from jax import lax
from jax.experimental import pallas as pl
from jax.experimental.pallas import tpu as pltpu


# --------------------------------------------------------------------------
# tiling / dtype policy per TPU generation
# --------------------------------------------------------------------------
def _pick_tiling(n_points):
    """Return (sub_m, block_m, combine_dtype).

    sub_m   : lanes per matmul chunk (fills the MXU N dim: 256 on v6e/v7x,
              128 on v5e/older).
    block_m : points per grid step (sub_m * n_chunks, up to 512) — amortizes
              the fixed per-grid-step overhead.
    combine_dtype : dtype of the expansion-dot outputs and of the wy_e*wx_e
              elementwise combine (bf16 where the VPU is bf16-native).
    """
    kind = ""
    try:
        kind = jax.devices()[0].device_kind.lower()
    except Exception:  # pragma: no cover - device query is best-effort
        pass
    older = any(v in kind for v in ("v2", "v3", "v4", "v5"))
    sub_pref = 128 if older else 256
    combine_dtype = jnp.float32 if older else jnp.bfloat16

    n128 = -(-n_points // 128) * 128
    sub_m = min(sub_pref, n128)
    block_m = min(512, -(-n_points // sub_m) * sub_m)
    block_m = max(sub_m, (block_m // sub_m) * sub_m)
    return sub_m, block_m, combine_dtype


# --------------------------------------------------------------------------
# forward(): famp.expand(B, -1, -1, -1)
# --------------------------------------------------------------------------
def _expand_kernel(famp_ref, out_ref):
    # famp_ref: (1, C, HW) block, out_ref: (bb, C, HW) block; lane axis is HW
    # (multiple of 128) -> unmasked stores.
    out_ref[...] = jnp.broadcast_to(famp_ref[...], out_ref.shape)


def uvfeature_forward(famp, batch):
    """famp: (1, C, H, W) -> (batch, C, H, W) broadcast, done on-chip.

    NOTE: for sampling do NOT materialize this — grid_sample_pallas accepts
    the batch-1 famp directly (broadcast fast path), removing the duplicated
    HBM traffic entirely.
    """
    _, C, H, W = famp.shape
    HW = H * W
    famp2 = famp.reshape(1, C, HW)  # free reshape: lane-dense last dim

    row_bytes = C * HW * famp.dtype.itemsize
    bb = max(1, min(batch, (2 << 20) // max(1, row_bytes)))
    while batch % bb:
        bb -= 1

    out = pl.pallas_call(
        _expand_kernel,
        out_shape=jax.ShapeDtypeStruct((batch, C, HW), famp.dtype),
        grid=(batch // bb,),
        in_specs=[pl.BlockSpec((1, C, HW), lambda b: (0, 0, 0))],   # resident
        out_specs=pl.BlockSpec((bb, C, HW), lambda b: (b, 0, 0)),
        compiler_params=pltpu.CompilerParams(dimension_semantics=("parallel",)),
    )(famp2)
    return out.reshape(batch, C, H, W)


# --------------------------------------------------------------------------
# grid_sample (bilinear, matching the PyTorch reference's clamp/extrapolate
# semantics exactly, including duplicate clamped corners which simply add).
# --------------------------------------------------------------------------
def _grid_sample_kernel(bid_ref, ix_ref, iy_ref, img_ref, ry_ref, rx_ref,
                        out_ref, *, IH, IW, sub_m, n_chunks,
                        compute_dtype, combine_dtype):
    del bid_ref  # only consumed by the index_maps (scalar prefetch)

    img = img_ref[0]                                   # (C, HW) compute_dtype

    # Loop-invariant index grids, hoisted (JAX doesn't CSE broadcasts).
    h_iota = lax.broadcasted_iota(jnp.int32, (IH, sub_m), 0)
    w_iota = lax.broadcasted_iota(jnp.int32, (IW, sub_m), 0)

    # Static, fully-unrolled chunk loop.  sub_m-wide, 128-aligned lane slices
    # keep every load/store unmasked and bound the (HW, sub_m) intermediates.
    for c in range(n_chunks):
        sl = slice(c * sub_m, (c + 1) * sub_m)

        # Un-normalize coordinates (work at (1, sub_m)).
        ix = (ix_ref[0, :, sl] + 1.0) * 0.5 * (IW - 1)
        iy = (iy_ref[0, :, sl] + 1.0) * 0.5 * (IH - 1)
        ix0 = jnp.floor(ix)
        iy0 = jnp.floor(iy)
        fx = ix - ix0                                   # unclamped fractions ->
        fy = iy - iy0                                   # faithful extrapolation

        # Clamp corner indices for the gather (weights stay unclamped).
        ix0i = jnp.clip(ix0, 0.0, IW - 1.0).astype(jnp.int32)
        ix1i = jnp.clip(ix0 + 1.0, 0.0, IW - 1.0).astype(jnp.int32)
        iy0i = jnp.clip(iy0, 0.0, IH - 1.0).astype(jnp.int32)
        iy1i = jnp.clip(iy0 + 1.0, 0.0, IH - 1.0).astype(jnp.int32)

        # Factored 2-hot bilinear weights (tiny arrays, cheap VALU work).
        # Duplicate clamped corners land on the same row and add — identical
        # to the reference's summed 4-corner gather.  Cast to bf16 for the
        # MXU (Ry/Rx are exact 0/1; fy/fx lose ~2^-9 — inside the budget).
        wy2 = (jnp.where(h_iota == iy0i, 1.0 - fy, 0.0)
               + jnp.where(h_iota == iy1i, fy, 0.0)).astype(compute_dtype)
        wx2 = (jnp.where(w_iota == ix0i, 1.0 - fx, 0.0)
               + jnp.where(w_iota == ix1i, fx, 0.0)).astype(compute_dtype)

        # Expand to (HW, sub_m) through the MXU with constant 0/1 expansion
        # matrices (Ry[k, h] = [k // IW == h], Rx[k, w] = [k % IW == w]);
        # one elementwise multiply gives the factored one-hot weight matrix
        #   wmat[h*IW + w, n] = wy2[h, n] * wx2[w, n].
        wy_e = jnp.dot(ry_ref[...], wy2, preferred_element_type=combine_dtype)
        wx_e = jnp.dot(rx_ref[...], wx2, preferred_element_type=combine_dtype)
        wmat = (wy_e * wx_e).astype(compute_dtype)        # (HW, sub_m)

        # gather + bilinear blend == one (C, HW) @ (HW, sub_m) matmul, bf16
        # operands, f32 accumulation; output chunk (C, sub_m) is lane-dense.
        out = jnp.dot(img, wmat, preferred_element_type=jnp.float32)
        out_ref[0, :, sl] = out.astype(out_ref.dtype)


def grid_sample_pallas(image, p2d, *, compute_dtype=jnp.bfloat16):
    """image: (imgB, C, IH, IW) with imgB in {1, B}; p2d: (B, *pts, 2) in [-1, 1].

    imgB == 1 is the batch-broadcast fast path (the UVFeature famp): all B*N
    points are flattened into one axis and sampled against the single map,
    which stays fully VMEM-resident across the whole grid.
    Returns (B, *pts, C) — same layout as the PyTorch reference.
    Pass compute_dtype=jnp.float32 for an f32-exact (slower) path.
    """
    imgB, C, IH, IW = image.shape
    B = p2d.shape[0]
    assert p2d.shape[-1] == 2
    assert imgB in (1, B), "image batch must be 1 (broadcast) or match p2d batch"
    points_shape = p2d.shape[1:-1]
    HW = IH * IW

    p = p2d.reshape(B, -1, 2).astype(jnp.float32)
    N = p.shape[1]

    if imgB == 1:
        # Broadcast feature map: flatten all B*N points.
        P = B * N
        sub_m, block_m, combine_dtype = _pick_tiling(P)
        Pp = -(-P // block_m) * block_m
        coords = jnp.pad(p.reshape(P, 2), ((0, Pp - P), (0, 0)))
        G = Pp // block_m
        bid = jnp.zeros((G,), jnp.int32)                 # image block index / tile
        ix = coords[:, 0].reshape(G, 1, block_m)
        iy = coords[:, 1].reshape(G, 1, block_m)
    else:
        # Per-batch image: tile each batch's points separately.
        sub_m, block_m, combine_dtype = _pick_tiling(N)
        Np = -(-N // block_m) * block_m
        pc = jnp.pad(p, ((0, 0), (0, Np - N), (0, 0)))
        tiles_per_b = Np // block_m
        G = B * tiles_per_b
        bid = jnp.repeat(jnp.arange(B, dtype=jnp.int32), tiles_per_b)
        ix = pc[..., 0].reshape(G, 1, block_m)
        iy = pc[..., 1].reshape(G, 1, block_m)

    if compute_dtype == jnp.float32:       # documented exact slow path
        combine_dtype = jnp.float32
    n_chunks = block_m // sub_m

    # Feature map as (imgB, C, HW): a free reshape of NCHW (no HBM transpose),
    # cast once to the MXU dtype (halves its DMA traffic too).
    img_flat = image.reshape(imgB, C, HW).astype(compute_dtype)

    # Constant 0/1 expansion matrices for the factored weight construction,
    # built directly in the MXU dtype (exact in bf16).
    k = jnp.arange(HW, dtype=jnp.int32)
    ry = (k[:, None] // IW == jnp.arange(IH, dtype=jnp.int32)[None, :]).astype(compute_dtype)
    rx = (k[:, None] % IW == jnp.arange(IW, dtype=jnp.int32)[None, :]).astype(compute_dtype)

    kernel = functools.partial(
        _grid_sample_kernel, IH=IH, IW=IW, sub_m=sub_m, n_chunks=n_chunks,
        compute_dtype=compute_dtype, combine_dtype=combine_dtype)

    itemsize = np.dtype(compute_dtype).itemsize
    out_itemsize = np.dtype(image.dtype).itemsize
    flops = 2 * (C * HW + HW * (IH + IW)) * G * block_m
    bytes_accessed = (imgB * C * HW * itemsize + HW * (IH + IW) * itemsize
                      + 2 * G * block_m * 4 + G * C * block_m * out_itemsize)
    cost = pl.CostEstimate(flops=int(flops), transcendentals=0,
                           bytes_accessed=int(bytes_accessed))

    # Raise the scoped-VMEM limit only when the working set would not fit the
    # conservative default (never triggered at small HW/C).
    est_vmem = (4 * C * HW * itemsize            # feature map, double-buffered
                + 4 * HW * (IH + IW) * itemsize  # Ry/Rx, double-buffered
                + 8 * block_m * 4                # coordinate blocks
                + 2 * C * block_m * 4            # output blocks
                + 8 * HW * sub_m * 4)            # intermediate headroom
    cparams = dict(dimension_semantics=("parallel",))
    if est_vmem > 16 * 1024 * 1024:
        cparams["vmem_limit_bytes"] = min(int(est_vmem * 2), 96 * 1024 * 1024)

    out = pl.pallas_call(
        kernel,
        out_shape=jax.ShapeDtypeStruct((G, C, block_m), image.dtype),
        grid_spec=pltpu.PrefetchScalarGridSpec(
            num_scalar_prefetch=1,                     # bid -> SMEM
            grid=(G,),
            in_specs=[
                pl.BlockSpec((1, 1, block_m), lambda g, bid_ref: (g, 0, 0)),       # ix tile
                pl.BlockSpec((1, 1, block_m), lambda g, bid_ref: (g, 0, 0)),       # iy tile
                pl.BlockSpec((1, C, HW), lambda g, bid_ref: (bid_ref[g], 0, 0)),   # feature map
                pl.BlockSpec((HW, IH), lambda g, bid_ref: (0, 0)),                 # Ry (resident)
                pl.BlockSpec((HW, IW), lambda g, bid_ref: (0, 0)),                 # Rx (resident)
            ],
            out_specs=pl.BlockSpec((1, C, block_m), lambda g, bid_ref: (g, 0, 0)),
        ),
        compiler_params=pltpu.CompilerParams(**cparams),
        cost_estimate=cost,
    )(bid, ix, iy, img_flat, ry, rx)

    # TODO(synk): for C >= 128 emit (block_m, C) tiles directly from the kernel
    # to skip this extra HBM pass; for small C (e.g. 32) the (C, block_m) store
    # is the lane-dense layout and this wrapper transpose is the cheap option.
    out = out.transpose(0, 2, 1).reshape(G * block_m, C)
    if imgB == 1:
        out = out[: B * N].reshape(B, N, C)
    else:
        out = out.reshape(B, -1, C)[:, :N]
    return out.reshape((B,) + tuple(points_shape) + (C,))


def uvfeature_sample_feat(p2d, fmap):
    # mirrors UVFeature.sample_feat(p2d, fmap) -> grid_sample(p2d, fmap):
    # the first argument is the image, the second the points (reference API).
    return grid_sample_pallas(p2d, fmap)


# --------------------------------------------------------------------------
# pure-JAX f32 reference (correctness check only)
# --------------------------------------------------------------------------
def _grid_sample_ref(image, p2d):
    B, C, IH, IW = image.shape
    points_shape = p2d.shape[1:-1]
    p = p2d.reshape(B, -1, 2).astype(jnp.float32)
    ix = (p[..., 0] + 1) / 2 * (IW - 1)
    iy = (p[..., 1] + 1) / 2 * (IH - 1)
    ix_nw = jnp.floor(ix); iy_nw = jnp.floor(iy)
    ix_ne = ix_nw + 1; iy_ne = iy_nw
    ix_sw = ix_nw; iy_sw = iy_nw + 1
    ix_se = ix_nw + 1; iy_se = iy_nw + 1
    nw = (ix_se - ix) * (iy_se - iy)
    ne = (ix - ix_sw) * (iy_sw - iy)
    sw = (ix_ne - ix) * (iy - iy_ne)
    se = (ix - ix_nw) * (iy - iy_nw)
    def cl(v, hi): return jnp.clip(v, 0, hi - 1)
    img = image.reshape(B, C, IH * IW)
    def gather(iyc, ixc):
        idx = (cl(iyc, IH) * IW + cl(ixc, IW)).astype(jnp.int32)
        return jnp.take_along_axis(img, idx[:, None, :].repeat(C, 1), axis=2)
    out = (gather(iy_nw, ix_nw) * nw[:, None, :]
           + gather(iy_ne, ix_ne) * ne[:, None, :]
           + gather(iy_sw, ix_sw) * sw[:, None, :]
           + gather(iy_se, ix_se) * se[:, None, :])
    return out.transpose(0, 2, 1).reshape((B,) + tuple(points_shape) + (C,))


if __name__ == "__main__":
    key = jax.random.PRNGKey(0)
    k_famp, k_in, k_pts = jax.random.split(key, 3)

    batch, feat_dim, feat_size = 2, 32, 16

    # deterministic parameter init (torch.randn(...) * 0.03 analogue)
    famp = 0.03 * jax.random.normal(
        k_famp, (1, feat_dim, feat_size, feat_size), dtype=jnp.float32)

    # forward() only uses input.shape[0]
    x = jax.random.normal(k_in, (batch, 4, 16, 16), dtype=jnp.float32)
    feat = jax.block_until_ready(uvfeature_forward(famp, x.shape[0]))
    assert feat.shape == (batch, feat_dim, feat_size, feat_size)
    np.testing.assert_array_equal(
        np.asarray(feat), np.broadcast_to(np.asarray(famp), feat.shape))

    p2d = jax.random.uniform(
        k_pts, (batch, 8, 8, 2), dtype=jnp.float32, minval=-1.0, maxval=1.0)

    # Fast path: sample directly from the batch-1 famp (no expanded map ever
    # materialized for sampling).
    sampled_fast = jax.block_until_ready(grid_sample_pallas(famp, p2d))
    # General path: per-batch image (the expanded map), via the reference API.
    sampled_gen = jax.block_until_ready(uvfeature_sample_feat(feat, p2d))
    assert sampled_fast.shape == (batch, 8, 8, feat_dim)
    assert sampled_gen.shape == (batch, 8, 8, feat_dim)

    ref = _grid_sample_ref(feat, p2d)
    # bf16 MXU inputs with f32 accumulation -> ~0.5% relative error budget.
    np.testing.assert_allclose(np.asarray(sampled_fast), np.asarray(ref),
                               rtol=2e-2, atol=2e-3)
    np.testing.assert_allclose(np.asarray(sampled_gen), np.asarray(ref),
                               rtol=2e-2, atol=2e-3)
    np.testing.assert_allclose(np.asarray(sampled_fast), np.asarray(sampled_gen),
                               rtol=0, atol=1e-6)

    print("KERNEL_OK")
</pallas_src>

<mosaic_0001>
module attributes {stable_mosaic.version = 11 : i64} {
  func.func @_expand_kernel(%arg0: i32, %arg1: memref<1x32x256xf32, #tpu.memory_space<vmem>>, %arg2: memref<2x32x256xf32, #tpu.memory_space<vmem>>) attributes {dimension_semantics = [#tpu.dimension_semantics<parallel>], iteration_bounds = array<i64: 1>, scalar_prefetch = 0 : i64, scratch_operands = 0 : i64, tpu.core_type = #tpu.core_type<tc>, window_params = [{pipeline_mode = #tpu.pipeline_mode<synchronous>, transform_indices = @transform_0, window_bounds = array<i64: 1, 32, 256>}, {transform_indices = @transform_1, window_bounds = array<i64: 2, 32, 256>}]} {
    %c0 = arith.constant 0 : index
    %c0_0 = arith.constant 0 : index
    %c0_1 = arith.constant 0 : index
    %0 = vector.load %arg1[%c0, %c0_0, %c0_1] : memref<1x32x256xf32, #tpu.memory_space<vmem>>, vector<1x32x256xf32>
    %1 = vector.shape_cast %0 : vector<1x32x256xf32> to vector<1x32x256xf32>
    %2 = vector.broadcast %1 : vector<1x32x256xf32> to vector<2x32x256xf32>
    %c0_2 = arith.constant 0 : index
    %c0_3 = arith.constant 0 : index
    %c0_4 = arith.constant 0 : index
    %3 = vector.load %arg2[%c0_2, %c0_3, %c0_4] : memref<2x32x256xf32, #tpu.memory_space<vmem>>, vector<2x32x256xf32>
    tpu.vector_store %arg2[%c0_2, %c0_3, %c0_4], %2 {strides = array<i32>} : memref<2x32x256xf32, #tpu.memory_space<vmem>>, vector<2x32x256xf32>,
    return
  }
  func.func @transform_0(%arg0: i32) -> (i32, i32, i32) {
    %c0_i32 = arith.constant 0 : i32
    %c0_i32_0 = arith.constant 0 : i32
    %c0_i32_1 = arith.constant 0 : i32
    %c0_i32_2 = arith.constant 0 : i32
    return %c0_i32, %c0_i32_0, %c0_i32_1 : i32, i32, i32
  }
  func.func @transform_1(%arg0: i32) -> (i32, i32, i32) {
    %c0_i32 = arith.constant 0 : i32
    %c0_i32_0 = arith.constant 0 : i32
    %c0_i32_1 = arith.constant 0 : i32
    return %arg0, %c0_i32, %c0_i32_0 : i32, i32, i32
  }
}

</mosaic_0001>

<bundles_post_ra>
// kernel: tpu_custom_call.1
= control target key start
LH: loop header
LB: loop body
LE: loop exit
PB: predicated region body
PF: predicated region fallthrough
CT: control target
= control target key end

     0   :  { %6 = vsyncpa [#allocation3], 0  ;;  %s150_s0 = inlined_call_operand.hbm [shape: f32[1,32,256], index: 0, kind: input, shape index: {}]   ;;  %s151_s1 = inlined_call_operand.hbm [shape: f32[2,32,256], index: 1, kind: output, shape index: {}]  }
   0x1   :  { %7 = vsyncpa [#allocation4], 0  ;;  %s12_s8 = sshll.u32 %s150_s0, 4  ;;  %s124_s9 = smov [#allocation2]   ;;  %s13_s8 = int_to_ptr.hbm [resolvable:$true] %s12_s8 }
   0x2   :  { %s14_s10 = sshll.u32 %s124_s9, 4  ;;  %s125_s11 = smov 256   ;;  %s15_s10 = int_to_ptr.vmem [resolvable:$true] %s14_s10 }
   0x3   :  { %s126_s12 = smov 16  }
   0x4   :  { %20 = dma.hbm_to_vmem [thread:$0]  %s13_s8, 1024, %s15_s10, [#allocation3], %s125_s11, %s125_s11, %s126_s12  }
   0x5   :  { %120 = dma.done.wait [#allocation3], 1024  }
   0x6   :  { %121 = vsyncadd [#allocation3], 4294966272  ;;  %v25_v0 = vld [vmem:[#allocation2] sm:$0xff]  ;;  %v26_v1 = vld [vmem:[#allocation2 + $0x8] sm:$0xff]  ;;  %s127_s0 = smov [#allocation5]   ;;  %s55_s16 = sshll.u32 %s151_s1, 4  ;;  %s56_s16 = int_to_ptr.hbm [resolvable:$true] %s55_s16 }
   0x7   :  { %33 = vst [vmem:[#allocation5] sm:$0xff] %v25_v0  ;;  %v27_v2 = vld [vmem:[#allocation2 + $0x10] sm:$0xff]  ;;  %v28_v3 = vld [vmem:[#allocation2 + $0x18] sm:$0xff]  ;;  %v29_v4 = vld [vmem:[#allocation2 + $0x20] sm:$0xff]  ;;  %s53_s13 = sshll.u32 %s127_s0, 4  ;;  %s54_s13 = int_to_ptr.vmem [resolvable:$true] %s53_s13 }
   0x8   :  { %41 = vst [vmem:[#allocation5 + $0x40] sm:$0xff] %v25_v0  ;;  %v30_v5 = vld [vmem:[#allocation2 + $0x28] sm:$0xff]  ;;  %v31_v6 = vld [vmem:[#allocation2 + $0x30] sm:$0xff]  ;;  %v32_v7 = vld [vmem:[#allocation2 + $0x38] sm:$0xff] }
   0x9   :  { %34 = vst [vmem:[#allocation5 + $0x8] sm:$0xff] %v26_v1 }
   0xa   :  { %42 = vst [vmem:[#allocation5 + $0x48] sm:$0xff] %v26_v1 }
   0xb   :  { %35 = vst [vmem:[#allocation5 + $0x10] sm:$0xff] %v27_v2 }
   0xc   :  { %43 = vst [vmem:[#allocation5 + $0x50] sm:$0xff] %v27_v2 }
   0xd   :  { %36 = vst [vmem:[#allocation5 + $0x18] sm:$0xff] %v28_v3 }
   0xe   :  { %44 = vst [vmem:[#allocation5 + $0x58] sm:$0xff] %v28_v3 }
   0xf   :  { %37 = vst [vmem:[#allocation5 + $0x20] sm:$0xff] %v29_v4 }
  0x10   :  { %45 = vst [vmem:[#allocation5 + $0x60] sm:$0xff] %v29_v4 }
  0x11   :  { %38 = vst [vmem:[#allocation5 + $0x28] sm:$0xff] %v30_v5 }
  0x12   :  { %46 = vst [vmem:[#allocation5 + $0x68] sm:$0xff] %v30_v5 }
  0x13   :  { %39 = vst [vmem:[#allocation5 + $0x30] sm:$0xff] %v31_v6 }
  0x14   :  { %47 = vst [vmem:[#allocation5 + $0x70] sm:$0xff] %v31_v6 }
  0x15   :  { %40 = vst [vmem:[#allocation5 + $0x38] sm:$0xff] %v32_v7 }
  0x16   :  { %48 = vst [vmem:[#allocation5 + $0x78] sm:$0xff] %v32_v7 }
  0x17   :  { %61 = dma.vmem_to_hbm [thread:$0]  %s54_s13, 2048, %s56_s16, [#allocation4], %s125_s11, %s125_s11, %s126_s12  }
  0x18   :  { %122 = dma.done.wait [#allocation4], 2048  }
  0x19   :  { %123 = vsyncadd [#allocation4], 4294965248 }
  0x1a   :  { %66 = vsyncpa [#allocation3], 1 }
  0x1b   :  { %67 = vsyncpa [#allocation4], 1 }

</bundles_post_ra>
